<compile_context>
chip_gen: v6e
topology: v6e:2x2x1
jax: 0.10.0
libtpu: 0.0.40
codegen_flags: <defaults>
</compile_context>

<pallas_src>
import functools

import jax
import jax.numpy as jnp
from jax.experimental import pallas as pl
from jax.experimental.pallas import tpu as pltpu


def _round_up(x, m):
    return (x + m - 1) // m * m


def _choose_seq_tile(S, tb, H, itemsize, max_bytes_per_buf=8 * 1024 * 1024):
    """Largest seq tile that is a multiple of 8, divides S, and fits the budget."""
    if S % 8 != 0:
        # TODO(synk): for very long S that is not a multiple of 8, pad S in the
        # wrapper instead of falling back to a single full-S block.
        return S
    cap = (max_bytes_per_buf // max(1, tb * H * itemsize)) // 8 * 8
    cap = max(8, min(512, cap, S))
    best = 8
    t = 8
    while t <= cap:
        if S % t == 0:
            best = t
        t += 8
    return best


def _head_kernel(x_ref, w1_ref, b1_ref, w2_ref, b2_ref, labels_ref,
                 probs_ref, nll_ref, acc_ref, *, inv_seq_len, num_classes):
    s = pl.program_id(1)

    @pl.when(s == 0)
    def _init():
        acc_ref[...] = jnp.zeros_like(acc_ref)

    # Pooled-sum accumulation over the sequence tiles (f32 accumulator).
    x = x_ref[...].astype(jnp.float32)                       # [tb, ts, H]
    acc_ref[...] += jnp.sum(x, axis=1)                       # [tb, H]

    @pl.when(s == pl.num_programs(1) - 1)
    def _finalize():
        pooled = acc_ref[...] * jnp.float32(inv_seq_len)     # mean over true S
        h = jnp.dot(pooled, w1_ref[...],
                    preferred_element_type=jnp.float32) + b1_ref[...]
        h = jnp.maximum(h, 0.0)                              # [tb, H2p]
        logits = jnp.dot(h, w2_ref[...],
                         preferred_element_type=jnp.float32) + b2_ref[...]

        cls = jax.lax.broadcasted_iota(jnp.int32, logits.shape, 1)
        valid = cls < num_classes                            # mask padded classes
        neg = jnp.float32(-1e30)

        # softmax(dim=-1) over the real classes (padded lanes -> prob 0).
        lmask = jnp.where(valid, logits, neg)
        m = jnp.max(lmask, axis=-1, keepdims=True)
        e = jnp.where(valid, jnp.exp(lmask - m), 0.0)
        probs = e / jnp.sum(e, axis=-1, keepdims=True)       # [tb, Cp]
        probs_ref[...] = probs

        # CrossEntropyLoss applied to the softmaxed values (as in the module).
        pmask = jnp.where(valid, probs, neg)
        m2 = jnp.max(pmask, axis=-1, keepdims=True)
        lse = jnp.log(jnp.sum(jnp.where(valid, jnp.exp(pmask - m2), 0.0),
                              axis=-1, keepdims=True)) + m2
        logp = probs - lse
        onehot = (cls == labels_ref[...]).astype(jnp.float32)
        nll = -jnp.sum(onehot * logp, axis=-1, keepdims=True)   # [tb, 1]
        nll_ref[...] = jnp.broadcast_to(nll, nll_ref.shape)     # lane-dense store


def classification_head_forward(x, labels, w1, b1, w2, b2):
    """x: [B, S, H] (any float dtype), labels: [B] int.

    Returns (loss scalar, probs [B, C]) matching the PyTorch module.
    """
    B, S, H = x.shape
    H2 = w1.shape[1]
    C = w2.shape[1]
    H2p = _round_up(H2, 128)
    Cp = _round_up(C, 128)

    # Batch tiling: 8-row blocks when possible (MXU/sublane friendly, enables
    # megacore split), otherwise a single full-batch block (leading dim of a
    # 3-D block has no (8,128) constraint, so no padding copy of x is needed).
    tb = 8 if (B % 8 == 0) else B
    ts = _choose_seq_tile(S, tb, H, x.dtype.itemsize)
    grid = (B // tb, S // ts)

    # Lane-dense, zero-padded weights (padded classes are masked in-kernel).
    w1p = jnp.pad(w1.astype(jnp.float32), ((0, 0), (0, H2p - H2)))
    b1p = jnp.pad(b1.astype(jnp.float32), (0, H2p - H2)).reshape(1, H2p)
    w2p = jnp.pad(w2.astype(jnp.float32), ((0, H2p - H2), (0, Cp - C)))
    b2p = jnp.pad(b2.astype(jnp.float32), (0, Cp - C)).reshape(1, Cp)
    labels2d = labels.astype(jnp.int32).reshape(B, 1)

    kernel = functools.partial(_head_kernel,
                               inv_seq_len=1.0 / S, num_classes=C)

    flops = 2 * B * S * H + 2 * B * H * H2p + 2 * B * H2p * Cp + 10 * B * Cp
    transcendentals = 3 * B * Cp
    bytes_accessed = (x.size * x.dtype.itemsize
                      + 4 * (w1p.size + b1p.size + w2p.size + b2p.size)
                      + 4 * (B * Cp + B * 128 + B))

    # VMEM budget: double-buffered x tiles + (small) weights/outputs/scratch.
    est = (2 * tb * ts * H * x.dtype.itemsize
           + 2 * 4 * (H * H2p + H2p * Cp + H2p + Cp + tb)
           + 2 * 4 * (tb * Cp + tb * 128)
           + 4 * tb * H)
    vmem_limit = int(min(64 * 1024 * 1024, max(2 * est, 4 * 1024 * 1024)))

    probs, nll = pl.pallas_call(
        kernel,
        out_shape=(jax.ShapeDtypeStruct((B, Cp), jnp.float32),
                   jax.ShapeDtypeStruct((B, 128), jnp.float32)),
        grid=grid,
        in_specs=[
            pl.BlockSpec((tb, ts, H), lambda b, s: (b, s, 0)),   # x (native dtype)
            pl.BlockSpec((H, H2p), lambda b, s: (0, 0)),         # w1
            pl.BlockSpec((1, H2p), lambda b, s: (0, 0)),         # b1
            pl.BlockSpec((H2p, Cp), lambda b, s: (0, 0)),        # w2
            pl.BlockSpec((1, Cp), lambda b, s: (0, 0)),          # b2
            pl.BlockSpec((tb, 1), lambda b, s: (b, 0)),          # labels
        ],
        out_specs=(pl.BlockSpec((tb, Cp), lambda b, s: (b, 0)),
                   pl.BlockSpec((tb, 128), lambda b, s: (b, 0))),
        scratch_shapes=[pltpu.VMEM((tb, H), jnp.float32)],
        compiler_params=pltpu.CompilerParams(
            dimension_semantics=("parallel", "arbitrary"),
            vmem_limit_bytes=vmem_limit),
        cost_estimate=pl.CostEstimate(flops=flops,
                                      transcendentals=transcendentals,
                                      bytes_accessed=bytes_accessed),
    )(x, w1p, b1p, w2p, b2p, labels2d)

    loss = jnp.mean(nll[:, 0])          # tiny [B] reduce finished in the wrapper
    return loss, probs[:, :C]


def init_params(key, hidden_size, num_classes):
    """Deterministic init mirroring nn.Linear shapes (stored transposed: [in, out])."""
    h2 = hidden_size // 2
    k1, k2, k3, k4 = jax.random.split(key, 4)
    lim1 = 1.0 / jnp.sqrt(hidden_size)
    lim2 = 1.0 / jnp.sqrt(h2)
    w1 = jax.random.uniform(k1, (hidden_size, h2), jnp.float32, -lim1, lim1)
    b1 = jax.random.uniform(k2, (h2,), jnp.float32, -lim1, lim1)
    w2 = jax.random.uniform(k3, (h2, num_classes), jnp.float32, -lim2, lim2)
    b2 = jax.random.uniform(k4, (num_classes,), jnp.float32, -lim2, lim2)
    return w1, b1, w2, b2


def reference_forward(x, labels, w1, b1, w2, b2):
    """Pure-JAX reference mirroring the PyTorch module exactly (f32 math)."""
    x = x.astype(jnp.float32)
    pooled = jnp.mean(x, axis=-2)
    h = jnp.maximum(pooled @ w1 + b1, 0.0)
    logits = h @ w2 + b2
    probs = jax.nn.softmax(logits, axis=-1)
    logp = jax.nn.log_softmax(probs, axis=-1)
    loss = -jnp.mean(jnp.take_along_axis(logp, labels[:, None], axis=-1))
    return loss, probs


if __name__ == "__main__":
    # Small shapes consistent with the module: [batch, seq, hidden], labels [batch].
    B, S, H, C = 2, 8, 32, 20   # classification_head_hidden_size=32, num_pages=20
    key = jax.random.PRNGKey(0)
    kx, kl, kp = jax.random.split(key, 3)

    # Ship x in bf16 (native transport dtype); all kernel math is f32.
    x = jax.random.normal(kx, (B, S, H), jnp.float32).astype(jnp.bfloat16)
    labels = jax.random.randint(kl, (B,), 0, C, jnp.int32)
    w1, b1, w2, b2 = init_params(kp, H, C)

    loss, probs = classification_head_forward(x, labels, w1, b1, w2, b2)
    loss = jax.block_until_ready(loss)
    probs = jax.block_until_ready(probs)

    # Sanity check against pure-JAX reference (same bf16 input values).
    ref_loss, ref_probs = reference_forward(x, labels, w1, b1, w2, b2)
    assert jnp.allclose(loss, ref_loss, atol=2e-5, rtol=2e-5), (loss, ref_loss)
    assert jnp.allclose(probs, ref_probs, atol=2e-5, rtol=2e-5)

    print("KERNEL_OK")
</pallas_src>

<mosaic_0001>
module attributes {stable_mosaic.version = 11 : i64} {
  func.func @_head_kernel(%arg0: i32, %arg1: i32, %arg2: memref<2x8x32xbf16, #tpu.memory_space<vmem>>, %arg3: memref<32x128xf32, #tpu.memory_space<vmem>>, %arg4: memref<1x128xf32, #tpu.memory_space<vmem>>, %arg5: memref<128x128xf32, #tpu.memory_space<vmem>>, %arg6: memref<1x128xf32, #tpu.memory_space<vmem>>, %arg7: memref<2x1xi32, #tpu.memory_space<vmem>>, %arg8: memref<2x128xf32, #tpu.memory_space<vmem>>, %arg9: memref<2x128xf32, #tpu.memory_space<vmem>>, %arg10: memref<2x32xf32, #tpu.memory_space<vmem>>) attributes {dimension_semantics = [#tpu.dimension_semantics<parallel>, #tpu.dimension_semantics<arbitrary>], iteration_bounds = array<i64: 1, 1>, scalar_prefetch = 0 : i64, scratch_operands = 1 : i64, tpu.core_type = #tpu.core_type<tc>, window_params = [{transform_indices = @transform_0, window_bounds = array<i64: 2, 8, 32>}, {pipeline_mode = #tpu.pipeline_mode<synchronous>, transform_indices = @transform_1, window_bounds = array<i64: 32, 128>}, {pipeline_mode = #tpu.pipeline_mode<synchronous>, transform_indices = @transform_2, window_bounds = array<i64: 1, 128>}, {pipeline_mode = #tpu.pipeline_mode<synchronous>, transform_indices = @transform_3, window_bounds = array<i64: 128, 128>}, {pipeline_mode = #tpu.pipeline_mode<synchronous>, transform_indices = @transform_4, window_bounds = array<i64: 1, 128>}, {transform_indices = @transform_5, window_bounds = array<i64: 2, 1>}, {transform_indices = @transform_6, window_bounds = array<i64: 2, 128>}, {transform_indices = @transform_7, window_bounds = array<i64: 2, 128>}]} {
    %c0_i32 = arith.constant 0 : i32
    %0 = arith.cmpi eq, %arg1, %c0_i32 : i32
    %1 = arith.extui %0 : i1 to i32
    %c0_i32_0 = arith.constant 0 : i32
    %2 = arith.cmpi ne, %1, %c0_i32_0 : i32
    scf.if %2 {
      %cst_9 = arith.constant 0.000000e+00 : f32
      %12 = vector.broadcast %cst_9 : f32 to vector<2x32xf32>
      %c0_10 = arith.constant 0 : index
      %c0_11 = arith.constant 0 : index
      %13 = vector.load %arg10[%c0_10, %c0_11] : memref<2x32xf32, #tpu.memory_space<vmem>>, vector<2x32xf32>
      tpu.vector_store %arg10[%c0_10, %c0_11], %12 {strides = array<i32>} : memref<2x32xf32, #tpu.memory_space<vmem>>, vector<2x32xf32>,
    } else {
    }
    %c0 = arith.constant 0 : index
    %c0_1 = arith.constant 0 : index
    %c0_2 = arith.constant 0 : index
    %3 = vector.load %arg2[%c0, %c0_1, %c0_2] : memref<2x8x32xbf16, #tpu.memory_space<vmem>>, vector<2x8x32xbf16>
    %4 = arith.extf %3 : vector<2x8x32xbf16> to vector<2x8x32xf32>
    %c0_3 = arith.constant 0 : index
    %c0_4 = arith.constant 0 : index
    %5 = vector.load %arg10[%c0_3, %c0_4] : memref<2x32xf32, #tpu.memory_space<vmem>>, vector<2x32xf32>
    %cst = arith.constant dense<0.000000e+00> : vector<2x32xf32>
    %6 = vector.multi_reduction <add>, %4, %cst [1] : vector<2x8x32xf32> to vector<2x32xf32>
    %7 = arith.addf %5, %6 : vector<2x32xf32>
    %c0_5 = arith.constant 0 : index
    %c0_6 = arith.constant 0 : index
    %8 = vector.load %arg10[%c0_5, %c0_6] : memref<2x32xf32, #tpu.memory_space<vmem>>, vector<2x32xf32>
    tpu.vector_store %arg10[%c0_5, %c0_6], %7 {strides = array<i32>} : memref<2x32xf32, #tpu.memory_space<vmem>>, vector<2x32xf32>,
    %c0_i32_7 = arith.constant 0 : i32
    %9 = arith.cmpi eq, %arg1, %c0_i32_7 : i32
    %10 = arith.extui %9 : i1 to i32
    %c0_i32_8 = arith.constant 0 : i32
    %11 = arith.cmpi ne, %10, %c0_i32_8 : i32
    scf.if %11 {
      %c0_9 = arith.constant 0 : index
      %c0_10 = arith.constant 0 : index
      %12 = vector.load %arg10[%c0_9, %c0_10] : memref<2x32xf32, #tpu.memory_space<vmem>>, vector<2x32xf32>
      %cst_11 = arith.constant 1.250000e-01 : f32
      %13 = vector.broadcast %cst_11 : f32 to vector<2x32xf32>
      %14 = arith.mulf %12, %13 : vector<2x32xf32>
      %c0_12 = arith.constant 0 : index
      %c0_13 = arith.constant 0 : index
      %15 = vector.load %arg3[%c0_12, %c0_13] : memref<32x128xf32, #tpu.memory_space<vmem>>, vector<32x128xf32>
      %cst_14 = arith.constant dense<0.000000e+00> : vector<2x128xf32>
      %16 = tpu.matmul %14, %15, %cst_14 {dimension_numbers = #tpu.dot_dimension_numbers<[1], [0], [0], [1], [0, 0, 1, 1], [], []>} : vector<2x32xf32>, vector<32x128xf32>, vector<2x128xf32> -> vector<2x128xf32>
      %c0_15 = arith.constant 0 : index
      %c0_16 = arith.constant 0 : index
      %17 = vector.load %arg4[%c0_15, %c0_16] : memref<1x128xf32, #tpu.memory_space<vmem>>, vector<1x128xf32>
      %18 = vector.broadcast %17 : vector<1x128xf32> to vector<2x128xf32>
      %19 = arith.addf %16, %18 : vector<2x128xf32>
      %cst_17 = arith.constant 0.000000e+00 : f32
      %20 = vector.broadcast %cst_17 : f32 to vector<2x128xf32>
      %21 = arith.maximumf %19, %20 : vector<2x128xf32>
      %c0_18 = arith.constant 0 : index
      %c0_19 = arith.constant 0 : index
      %22 = vector.load %arg5[%c0_18, %c0_19] : memref<128x128xf32, #tpu.memory_space<vmem>>, vector<128x128xf32>
      %cst_20 = arith.constant dense<0.000000e+00> : vector<2x128xf32>
      %23 = tpu.matmul %21, %22, %cst_20 {dimension_numbers = #tpu.dot_dimension_numbers<[1], [0], [0], [1], [0, 0, 1, 1], [], []>} : vector<2x128xf32>, vector<128x128xf32>, vector<2x128xf32> -> vector<2x128xf32>
      %c0_21 = arith.constant 0 : index
      %c0_22 = arith.constant 0 : index
      %24 = vector.load %arg6[%c0_21, %c0_22] : memref<1x128xf32, #tpu.memory_space<vmem>>, vector<1x128xf32>
      %25 = vector.broadcast %24 : vector<1x128xf32> to vector<2x128xf32>
      %26 = arith.addf %23, %25 : vector<2x128xf32>
      %27 = tpu.iota {dimensions = array<i32: 1>} : vector<2x128xi32>
      %c20_i32 = arith.constant 20 : i32
      %28 = vector.broadcast %c20_i32 : i32 to vector<2x128xi32>
      %29 = arith.cmpi slt, %27, %28 : vector<2x128xi32>
      %cst_23 = arith.constant -1.000000e+30 : f32
      %30 = vector.broadcast %cst_23 : f32 to vector<2x128xf32>
      %31 = arith.select %29, %26, %30 : vector<2x128xi1>, vector<2x128xf32>
      %cst_24 = arith.constant dense<0xFF800000> : vector<2xf32>
      %32 = vector.multi_reduction <maximumf>, %31, %cst_24 [1] : vector<2x128xf32> to vector<2xf32>
      %33 = vector.shape_cast %32 : vector<2xf32> to vector<2x1xf32>
      %34 = vector.broadcast %33 : vector<2x1xf32> to vector<2x128xf32>
      %35 = arith.subf %31, %34 : vector<2x128xf32>
      %36 = math.exp %35 : vector<2x128xf32>
      %cst_25 = arith.constant 0.000000e+00 : f32
      %37 = vector.broadcast %cst_25 : f32 to vector<2x128xf32>
      %38 = arith.select %29, %36, %37 : vector<2x128xi1>, vector<2x128xf32>
      %cst_26 = arith.constant dense<0.000000e+00> : vector<2xf32>
      %39 = vector.multi_reduction <add>, %38, %cst_26 [1] : vector<2x128xf32> to vector<2xf32>
      %40 = vector.shape_cast %39 : vector<2xf32> to vector<2x1xf32>
      %41 = vector.broadcast %40 : vector<2x1xf32> to vector<2x128xf32>
      %42 = arith.divf %38, %41 : vector<2x128xf32>
      %c0_27 = arith.constant 0 : index
      %c0_28 = arith.constant 0 : index
      %43 = vector.load %arg8[%c0_27, %c0_28] : memref<2x128xf32, #tpu.memory_space<vmem>>, vector<2x128xf32>
      tpu.vector_store %arg8[%c0_27, %c0_28], %42 {strides = array<i32>} : memref<2x128xf32, #tpu.memory_space<vmem>>, vector<2x128xf32>,
      %cst_29 = arith.constant -1.000000e+30 : f32
      %44 = vector.broadcast %cst_29 : f32 to vector<2x128xf32>
      %45 = arith.select %29, %42, %44 : vector<2x128xi1>, vector<2x128xf32>
      %cst_30 = arith.constant dense<0xFF800000> : vector<2xf32>
      %46 = vector.multi_reduction <maximumf>, %45, %cst_30 [1] : vector<2x128xf32> to vector<2xf32>
      %47 = vector.shape_cast %46 : vector<2xf32> to vector<2x1xf32>
      %48 = vector.broadcast %47 : vector<2x1xf32> to vector<2x128xf32>
      %49 = arith.subf %45, %48 : vector<2x128xf32>
      %50 = math.exp %49 : vector<2x128xf32>
      %cst_31 = arith.constant 0.000000e+00 : f32
      %51 = vector.broadcast %cst_31 : f32 to vector<2x128xf32>
      %52 = arith.select %29, %50, %51 : vector<2x128xi1>, vector<2x128xf32>
      %cst_32 = arith.constant dense<0.000000e+00> : vector<2xf32>
      %53 = vector.multi_reduction <add>, %52, %cst_32 [1] : vector<2x128xf32> to vector<2xf32>
      %54 = vector.shape_cast %53 : vector<2xf32> to vector<2x1xf32>
      %55 = math.log %54 : vector<2x1xf32>
      %56 = arith.addf %55, %47 : vector<2x1xf32>
      %57 = vector.broadcast %56 : vector<2x1xf32> to vector<2x128xf32>
      %58 = arith.subf %42, %57 : vector<2x128xf32>
      %c0_33 = arith.constant 0 : index
      %c0_34 = arith.constant 0 : index
      %59 = vector.load %arg7[%c0_33, %c0_34] : memref<2x1xi32, #tpu.memory_space<vmem>>, vector<2x1xi32>
      %60 = vector.broadcast %59 : vector<2x1xi32> to vector<2x128xi32>
      %61 = arith.cmpi eq, %27, %60 : vector<2x128xi32>
      %62 = arith.extui %61 : vector<2x128xi1> to vector<2x128xi32>
      %63 = arith.sitofp %62 : vector<2x128xi32> to vector<2x128xf32>
      %64 = arith.mulf %63, %58 : vector<2x128xf32>
      %cst_35 = arith.constant dense<0.000000e+00> : vector<2xf32>
      %65 = vector.multi_reduction <add>, %64, %cst_35 [1] : vector<2x128xf32> to vector<2xf32>
      %66 = vector.shape_cast %65 : vector<2xf32> to vector<2x1xf32>
      %cst_36 = arith.constant 0.000000e+00 : f32
      %67 = vector.broadcast %cst_36 : f32 to vector<2x1xf32>
      %68 = arith.subf %67, %66 : vector<2x1xf32>
      %69 = vector.shape_cast %68 : vector<2x1xf32> to vector<2x1xf32>
      %70 = vector.broadcast %69 : vector<2x1xf32> to vector<2x128xf32>
      %c0_37 = arith.constant 0 : index
      %c0_38 = arith.constant 0 : index
      %71 = vector.load %arg9[%c0_37, %c0_38] : memref<2x128xf32, #tpu.memory_space<vmem>>, vector<2x128xf32>
      tpu.vector_store %arg9[%c0_37, %c0_38], %70 {strides = array<i32>} : memref<2x128xf32, #tpu.memory_space<vmem>>, vector<2x128xf32>,
    } else {
    }
    return
  }
  func.func @transform_0(%arg0: i32, %arg1: i32) -> (i32, i32, i32) {
    %c0_i32 = arith.constant 0 : i32
    %c0_i32_0 = arith.constant 0 : i32
    return %arg0, %arg1, %c0_i32 : i32, i32, i32
  }
  func.func @transform_1(%arg0: i32, %arg1: i32) -> (i32, i32) {
    %c0_i32 = arith.constant 0 : i32
    %c0_i32_0 = arith.constant 0 : i32
    %c0_i32_1 = arith.constant 0 : i32
    return %c0_i32, %c0_i32_0 : i32, i32
  }
  func.func @transform_2(%arg0: i32, %arg1: i32) -> (i32, i32) {
    %c0_i32 = arith.constant 0 : i32
    %c0_i32_0 = arith.constant 0 : i32
    %c0_i32_1 = arith.constant 0 : i32
    return %c0_i32, %c0_i32_0 : i32, i32
  }
  func.func @transform_3(%arg0: i32, %arg1: i32) -> (i32, i32) {
    %c0_i32 = arith.constant 0 : i32
    %c0_i32_0 = arith.constant 0 : i32
    %c0_i32_1 = arith.constant 0 : i32
    return %c0_i32, %c0_i32_0 : i32, i32
  }
  func.func @transform_4(%arg0: i32, %arg1: i32) -> (i32, i32) {
    %c0_i32 = arith.constant 0 : i32
    %c0_i32_0 = arith.constant 0 : i32
    %c0_i32_1 = arith.constant 0 : i32
    return %c0_i32, %c0_i32_0 : i32, i32
  }
  func.func @transform_5(%arg0: i32, %arg1: i32) -> (i32, i32) {
    %c0_i32 = arith.constant 0 : i32
    %c0_i32_0 = arith.constant 0 : i32
    return %arg0, %c0_i32 : i32, i32
  }
  func.func @transform_6(%arg0: i32, %arg1: i32) -> (i32, i32) {
    %c0_i32 = arith.constant 0 : i32
    %c0_i32_0 = arith.constant 0 : i32
    return %arg0, %c0_i32 : i32, i32
  }
  func.func @transform_7(%arg0: i32, %arg1: i32) -> (i32, i32) {
    %c0_i32 = arith.constant 0 : i32
    %c0_i32_0 = arith.constant 0 : i32
    return %arg0, %c0_i32 : i32, i32
  }
}

</mosaic_0001>

<bundles_post_ra>
// kernel: tpu_custom_call.1
= control target key start
LH: loop header
LB: loop body
LE: loop exit
PB: predicated region body
PF: predicated region fallthrough
CT: control target
= control target key end

     0   :  { %13 = vsyncpa [#allocation4], 0  ;;  %s680_s0 = inlined_call_operand.hbm [shape: bf16[2,8,32], index: 0, kind: input, shape index: {}]   ;;  %s681_s1 = inlined_call_operand.hbm [shape: f32[32,128], index: 1, kind: input, shape index: {}]   ;;  %s682_s2 = inlined_call_operand.vmem [shape: f32[1,128], index: 2, kind: input, shape index: {}]   ;;  %s683_s3 = inlined_call_operand.hbm [shape: f32[128,128], index: 3, kind: input, shape index: {}]   ;;  %s684_s4 = inlined_call_operand.vmem [shape: f32[1,128], index: 4, kind: input, shape index: {}]   ;;  %s685_s5 = inlined_call_operand.vmem [shape: s32[2,1], index: 5, kind: input, shape index: {}]   ;;  %s686_s6 = inlined_call_operand.hbm [shape: f32[2,128], index: 6, kind: output, shape index: {0}]   ;;  %s687_s7 = inlined_call_operand.hbm [shape: f32[2,128], index: 7, kind: output, shape index: {1}]  }
   0x1   :  { %14 = vsyncpa [#allocation7], 0 }
   0x2   :  { %15 = vsyncpa [#allocation5], 0 }
   0x3   :  { %16 = vsyncpa [#allocation11], 0  ;;  %s566_s24 = smov [#allocation6]  }
   0x4   :  { %s34_s25 = sshll.u32 %s566_s24, 4  ;;  %s35_s25 = int_to_ptr.vmem [resolvable:$true] %s34_s25 }
   0x5   :  { %s466_s26 = scalar_lea.vmem %s35_s25, 512  ;;  %p471_p1 = scmp.lt.s32.totalorder %s35_s25, %s35_s25 }
   0x6   :  { %p467_p0 = scmp.ne.s32.totalorder %s35_s25, %s466_s26  ;;  %p472_p2 = scmp.lt.s32.totalorder %s466_s26, %s466_s26 }
   0x8   :  { %p473_p3 = por %p472_p2, %p471_p1 }
   0xa   :  { %p474_p4 = pnand %p473_p3, %p467_p0 }
   0xc   :  { %477 = shalt.err (!%p474_p4)
}
   0xd   :  { %s567_s27 = smov 128   ;;  %s568_s28 = smov 8  }
   0xe   :  { %40 = dma.hbm_to_vmem [thread:$0]  %s681_s1, 512, %s35_s25, [#allocation7], %s567_s27, %s567_s27, %s568_s28  }
   0xf   :  { %s569_s8 = smov [#allocation3]  }
  0x10   :  { %s22_s9 = sshll.u32 %s569_s8, 4  ;;  %s23_s9 = int_to_ptr.vmem [resolvable:$true] %s22_s9 }
  0x11   :  { %s486_s10 = scalar_lea.vmem %s23_s9, 128  ;;  %p491_p6 = scmp.lt.s32.totalorder %s23_s9, %s23_s9 }
  0x12   :  { %p487_p5 = scmp.ne.s32.totalorder %s23_s9, %s486_s10  ;;  %p492_p7 = scmp.lt.s32.totalorder %s486_s10, %s486_s10 }
  0x14   :  { %p493_p8 = por %p492_p7, %p491_p6 }
  0x16   :  { %p494_p9 = pnand %p493_p8, %p487_p5 }
  0x18   :  { %497 = shalt.err (!%p494_p9)
}
  0x19   :  { %s570_s11 = smov 64   ;;  %s571_s12 = smov 4  }
  0x1a   :  { %28 = dma.hbm_to_vmem [thread:$0]  %s680_s0, 128, %s23_s9, [#allocation4], %s570_s11, %s570_s11, %s571_s12  }
  0x1b   :  { %s572_s15 = smov [#allocation8]  }
  0x1c   :  { %s48_s16 = sshll.u32 %s572_s15, 4  ;;  %s49_s16 = int_to_ptr.vmem [resolvable:$true] %s48_s16 }
  0x1d   :  { %s506_s1 = scalar_lea.vmem %s49_s16, 2048  ;;  %p511_p11 = scmp.lt.s32.totalorder %s49_s16, %s49_s16 }
  0x1e   :  { %p507_p10 = scmp.ne.s32.totalorder %s49_s16, %s506_s1  ;;  %p512_p12 = scmp.lt.s32.totalorder %s506_s1, %s506_s1 }
  0x20   :  { %p513_p13 = por %p512_p12, %p511_p11 }
  0x22   :  { %p514_p0 = pnand %p513_p13, %p507_p10 }
  0x24   :  { %517 = shalt.err (!%p514_p0)
}
  0x25   :  { %54 = dma.hbm_to_vmem [thread:$0]  %s683_s3, 2048, %s49_s16, [#allocation7], %s567_s27, %s567_s27, %s568_s28  }
  0x26   :  { %558 = dma.done.wait [#allocation4], 128  }
  0x27   :  { %559 = vsyncadd [#allocation4], 4294967168 }
  0x28   :  { %560 = dma.done.wait [#allocation7], 2560  }
  0x29   :  { %561 = vsyncadd [#allocation7], 4294964736  ;;  %vm72_vm0 = vcmask 254976   ;;  %v573_v0 = vmov 0.0   ;;  %vm574_vm1 = vmmov 0   ;;  %v110_v1 = vld [vmem:[#allocation6 + $0x18] sm:$0xff]  ;;  %v285_v48 = vlaneseq }
  0x2a   :  { %391 = vmatprep.subr.mxu0 %v573_v0  ;;  %399 = vmatprep.mubr.msk.f32.mxu0 %vm574_vm1, %v573_v0  ;;  %73 = vst.msk [vmem:[#allocation2] sm:$0x3] %vm72_vm0, %v573_v0  ;;  %v109_v2 = vld [vmem:[#allocation6 + $0x10] sm:$0xff]  ;;  %v366_v3 = vld [vmem:[#allocation3] sm:$0xff]   ;;  %vm79_vm2 = vcmask 261120   ;;  %v108_v4 = vld [vmem:[#allocation6 + $0x8] sm:$0xff] }
  0x2b   :  { %402 = vmatprep.subr.mxu1 %v573_v0  ;;  %434 = vmatprep.mubr.msk.f32.mxu1 %vm574_vm1, %v573_v0  ;;  %v367_v5 = vunpack.c.l.bf16 %v366_v3  ;;  %v368_v6 = vunpack.c.h.bf16 %v366_v3  ;;  %v207_v7 = vld [vmem:[#allocation8 + $0x78] sm:$0xff]  ;;  %v206_v8 = vld [vmem:[#allocation8 + $0x70] sm:$0xff]  ;;  %v107_v9 = vld [vmem:[#allocation6] sm:$0xff]  ;;  %vm96_vm3 = vcmask 1041409   ;;  %v286_v49 = vand.u32 127, %v285_v48 }
  0x2c   :  { %392 = vmatpush3.msra.mxu0 %v110_v1  ;;  %403 = vmatpush3.msra.mxu1 %v207_v7  ;;  %v205_v12 = vld [vmem:[#allocation8 + $0x68] sm:$0xff]  ;;  %v204_v15 = vld [vmem:[#allocation8 + $0x60] sm:$0xff]  ;;  %v203_v18 = vld [vmem:[#allocation8 + $0x58] sm:$0xff]  ;;  %vm289_vm5 = vcmask 1041408  }
  0x2d   :  { %393 = vmatprep.subr.mxu0 %v573_v0  ;;  %v80_v10 = vsel %vm79_vm2, %v367_v5, 0.0  ;;  %v87_v11 = vsel %vm79_vm2, %v368_v6, 0.0  ;;  %404 = vmatprep.subr.mxu1 %v573_v0  ;;  %v202_v21 = vld [vmem:[#allocation8 + $0x50] sm:$0xff]  ;;  %v201_v24 = vld [vmem:[#allocation8 + $0x48] sm:$0xff]  ;;  %v200_v27 = vld [vmem:[#allocation8 + $0x40] sm:$0xff]  ;;  %vm287_vm4 = vcmp.lt.s32.totalorder %v286_v49, 20 }
  0x2e   :  { %394 = vmatpush3.msra.mxu0 %v109_v2  ;;  %v81_v13 = vrot.slane %v80_v10, 4  ;;  %v88_v14 = vrot.slane %v87_v11, 4  ;;  %405 = vmatpush3.msra.mxu1 %v206_v8  ;;  %v199_v31 = vld [vmem:[#allocation8 + $0x38] sm:$0xff]  ;;  %v198_v34 = vld [vmem:[#allocation8 + $0x30] sm:$0xff]  ;;  %v197_v35 = vld [vmem:[#allocation8 + $0x28] sm:$0xff]  ;;  %v575_v5 = vmov 0  }
  0x2f   :  { %395 = vmatprep.subr.mxu0 %v573_v0  ;;  %406 = vmatprep.subr.mxu1 %v573_v0  ;;  %v196_v36 = vld [vmem:[#allocation8 + $0x20] sm:$0xff]  ;;  %v195_v37 = vld [vmem:[#allocation8 + $0x18] sm:$0xff]  ;;  %v194_v40 = vld [vmem:[#allocation8 + $0x10] sm:$0xff] }
  0x30   :  { %396 = vmatpush3.msra.mxu0 %v108_v4  ;;  %v82_v16 = vadd.f32 %v81_v13, %v80_v10  ;;  %v89_v17 = vadd.f32 %v88_v14, %v87_v11  ;;  %407 = vmatpush3.msra.mxu1 %v205_v12  ;;  %v193_v41 = vld [vmem:[#allocation8 + $0x8] sm:$0xff]  ;;  %v192_v42 = vld [vmem:[#allocation8] sm:$0xff]  ;;  %v361_v43 = vld [vmem:[%s682_s2] ss:$0 sm:$0xff] }
  0x31   :  { %397 = vmatprep.subr.mxu0 %v573_v0  ;;  %408 = vmatprep.subr.mxu1 %v573_v0  ;;  %v78_v28 = vld [vmem:[#allocation2] sm:$0x3] }
  0x32   :  { %398 = vmatpush3.msra.mxu0 %v107_v9  ;;  %v83_v19 = vrot.slane %v82_v16, 2  ;;  %v90_v20 = vrot.slane %v89_v17, 2  ;;  %409 = vmatpush3.msra.mxu1 %v204_v15  ;;  %v363_v50 = vld [vmem:[%s684_s4] ss:$0 sm:$0xff] }
  0x33   :  { %410 = vmatprep.subr.mxu1 %v573_v0  ;;  %v318_v4 = vld [vmem:[%s685_s5] sm:$0x3]  ;;  %449 = vset.pattern.permute.xlu0 %v575_v5  ;;  %s576_s5 = smov [#allocation9]  }
  0x34   :  { %v84_v22 = vadd.f32 %v83_v19, %v82_v16  ;;  %v91_v23 = vadd.f32 %v90_v20, %v89_v17  ;;  %411 = vmatpush3.msra.mxu1 %v203_v18  ;;  %s337_s21 = sshll.u32 %s576_s5, 4  ;;  %s338_s21 = int_to_ptr.vmem [resolvable:$true] %s337_s21 }
  0x35   :  { %412 = vmatprep.subr.mxu1 %v573_v0  ;;  %s518_s22 = scalar_lea.vmem %s338_s21, 32  ;;  %p523_p2 = scmp.lt.s32.totalorder %s338_s21, %s338_s21 }
  0x36   :  { %v85_v25 = vrot.slane %v84_v22, 1  ;;  %v92_v26 = vrot.slane %v91_v23, 1  ;;  %413 = vmatpush3.msra.mxu1 %v202_v21  ;;  %p519_p1 = scmp.ne.s32.totalorder %s338_s21, %s518_s22  ;;  %p524_p3 = scmp.lt.s32.totalorder %s518_s22, %s518_s22 }
  0x37   :  { %414 = vmatprep.subr.mxu1 %v573_v0 }
  0x38   :  { %v86_v29 = vadd.f32 %v85_v25, %v84_v22  ;;  %v93_v30 = vadd.f32 %v92_v26, %v91_v23  ;;  %415 = vmatpush3.msra.mxu1 %v201_v24  ;;  %p525_p4 = por %p524_p3, %p523_p2 }
  0x39   :  { %416 = vmatprep.subr.mxu1 %v573_v0 }
  0x3a   :  { %v97_v32 = vsel %vm96_vm3, %v93_v30, %v86_v29  ;;  %417 = vmatpush3.msra.mxu1 %v200_v27  ;;  %p526_p5 = pnand %p525_p4, %p519_p1 }
  0x3b   :  { %v99_v33 = vadd.f32 %v97_v32, %v78_v28  ;;  %418 = vmatprep.subr.mxu1 %v573_v0 }
  0x3c   :  { %419 = vmatpush3.msra.mxu1 %v199_v31 }
  0x3d   :  { %101 = vst.msk [vmem:[#allocation2] sm:$0x3] %vm72_vm0, %v99_v33  ;;  %420 = vmatprep.subr.mxu1 %v573_v0 }
  0x3e   :  { %421 = vmatpush3.msra.mxu1 %v198_v34 }
  0x3f   :  { %422 = vmatprep.subr.mxu1 %v573_v0 }
  0x40   :  { %423 = vmatpush3.msra.mxu1 %v197_v35 }
  0x41   :  { %424 = vmatprep.subr.mxu1 %v573_v0 }
  0x42   :  { %425 = vmatpush3.msra.mxu1 %v196_v36 }
  0x43   :  { %426 = vmatprep.subr.mxu1 %v573_v0 }
  0x44   :  { %v105_v38 = vld [vmem:[#allocation2] sm:$0x3]  ;;  %427 = vmatpush3.msra.mxu1 %v195_v37 }
  0x45   :  { %v106_v39 = vmul.f32 0.125, %v105_v38  ;;  %428 = vmatprep.subr.mxu1 %v573_v0 }
  0x46   :  { %429 = vmatpush3.msra.mxu1 %v194_v40 }
  0x47   :  { %400 = vmatmul.mubr.msk.f32.vlgmr.msra.gmra.mxu0 %vm79_vm2, %v106_v39  ;;  %430 = vmatprep.subr.mxu1 %v573_v0 }
  0x48   :  { %431 = vmatpush3.msra.mxu1 %v193_v41 }
  0x49   :  { %432 = vmatprep.subr.mxu1 %v573_v0 }
  0x4a   :  { %433 = vmatpush3.msra.mxu1 %v192_v42 }
 0x107   :  { %v187_v44 = vpop.f32.mrf.mxu0 }
 0x108   :  { %v188_v45 = vadd.f32 %v361_v43, %v187_v44 }
 0x109   :  { %v401_v46 = vpop.f32.mrf.mxu0 }
 0x10a   :  { %v191_v47 = vmax.f32 %v188_v45, 0.0 }
 0x10c   :  { %435 = vmatmul.mubr.f32.vlgmr.msra.gmra.mxu1 %v191_v47 }
 0x1cc   :  { %v281_v51 = vpop.f32.mrf.mxu1 }
 0x1cd   :  { %v282_v52 = vadd.f32 %v363_v50, %v281_v51 }
 0x1ce   :  { %v436_v53 = vpop.f32.mrf.mxu1 }
 0x1cf   :  { %v288_v54 = vsel %vm287_vm4, %v282_v52, -1e+30 }
 0x1d0   :  { %v290_v55 = vsel %vm289_vm5, %v288_v54, -inf }
 0x1d1   :  { %291 = vmax.xlane.f32.xlu0 %v290_v55 }
 0x25a   :  { %v292_v56 = vpop.xlane.xlu0 %291 }
 0x25b   :  { %v293_v57 = vsub.f32 %v288_v54, %v292_v56 }
 0x25d   :  { %v294_v58 = vmul.f32 1.442695, %v293_v57 }
 0x25f   :  { %450 = vpow2.f32 %v294_v58 }
 0x26c   :  { %v451_v59 = vpop.eup %450 }
 0x26d   :  { %v296_v60 = vsel %vm287_vm4, %v451_v59, 0.0 }
 0x26e   :  { %v297_v61 = vsel %vm289_vm5, %v296_v60, 0.0 }
 0x26f   :  { %298 = vadd.xlane.f32.xlu0 %v297_v61 }
 0x285   :  { %320 = vperm.xlu0 %449, %v318_v4  }
 0x2f8   :  { %v299_v62 = vpop.xlane.xlu0 %298 }
 0x2f9   :  { %452 = vrcp.f32 %v299_v62 }
 0x300   :  { %v321_v13 = vpop.permute.xlu0 %320 }
 0x301   :  { %vm322_vm6 = vcmp.eq.s32.totalorder %v286_v49, %v321_v13 }
 0x302   :  { %v364_v17 = vsel %vm322_vm6, 1.0, %v573_v0 }
 0x306   :  { %v453_v63 = vpop.eup %452 }
 0x307   :  { %v301_v1 = vmul.f32 %v453_v63, %v296_v60 }
 0x309   :  { %v303_v2 = vsel %vm287_vm4, %v301_v1, -1e+30  ;;  %302 = vst [vmem:[#allocation9] sm:$0x3] %v301_v1 }
 0x30a   :  { %v304_v3 = vsel %vm289_vm5, %v303_v2, -inf }
 0x30b   :  { %305 = vmax.xlane.f32.xlu1 %v304_v3 }
 0x394   :  { %v306_v6 = vpop.xlane.xlu1 %305 }
 0x395   :  { %v307_v7 = vsub.f32 %v303_v2, %v306_v6 }
 0x397   :  { %v308_v8 = vmul.f32 1.442695, %v307_v7 }
 0x399   :  { %454 = vpow2.f32 %v308_v8 }
 0x3a6   :  { %v455_v9 = vpop.eup %454 }
 0x3a7   :  { %v310_v10 = vsel %vm287_vm4, %v455_v9, 0.0 }
 0x3a8   :  { %v311_v11 = vsel %vm289_vm5, %v310_v10, 0.0 }
 0x3a9   :  { %312 = vadd.xlane.f32.xlu1 %v311_v11 }
 0x432   :  { %v313_v12 = vpop.xlane.xlu1 %312 }
 0x433   :  { %456 = vlog2.f32 %v313_v12 }
 0x440   :  { %v457_v14 = vpop.eup %456 }
 0x441   :  { %v315_v15 = vmul.f32 0.6931472, %v457_v14 }
 0x443   :  { %v316_v16 = vadd.f32 %v315_v15, %v306_v6 }
 0x445   :  { %v317_v18 = vsub.f32 %v301_v1, %v316_v16 }
 0x447   :  { %v325_v19 = vmul.f32 %v364_v17, %v317_v18 }
 0x449   :  { %v326_v20 = vsel %vm289_vm5, %v325_v19, 0.0 }
 0x44a   :  { %327 = vadd.xlane.f32.xlu1 %v326_v20 }
 0x44b   :  { %529 = shalt.err (!%p526_p5)
}
 0x44c   :  { %340 = dma.vmem_to_hbm [thread:$0]  %s338_s21, 32, %s686_s6, [#allocation5]  }
 0x44d   :  { %s577_s25 = smov [#allocation10]  }
 0x44e   :  { %s347_s26 = sshll.u32 %s577_s25, 4  ;;  %s348_s26 = int_to_ptr.vmem [resolvable:$true] %s347_s26 }
 0x44f   :  { %s538_s27 = scalar_lea.vmem %s348_s26, 32  ;;  %p543_p7 = scmp.lt.s32.totalorder %s348_s26, %s348_s26 }
 0x450   :  { %p539_p6 = scmp.ne.s32.totalorder %s348_s26, %s538_s27  ;;  %p544_p8 = scmp.lt.s32.totalorder %s538_s27, %s538_s27 }
 0x452   :  { %p545_p9 = por %p544_p8, %p543_p7 }
 0x454   :  { %p546_p10 = pnand %p545_p9, %p539_p6 }
 0x4d3   :  { %v328_v0 = vpop.xlane.xlu1 %327 }
 0x4d4   :  { %v329_v21 = vsub.f32 0.0, %v328_v0 }
 0x4d6   :  { %330 = vst [vmem:[#allocation10] sm:$0x3] %v329_v21 }
 0x4d7   :  { %549 = shalt.err (!%p546_p10)
}
 0x4d8   :  { %350 = dma.vmem_to_hbm [thread:$0]  %s348_s26, 32, %s687_s7, [#allocation11]  }
 0x4d9   :  { %562 = dma.done.wait [#allocation5], 32  }
 0x4da   :  { %563 = vsyncadd [#allocation5], 4294967264 }
 0x4db   :  { %564 = dma.done.wait [#allocation11], 32  }
 0x4dc   :  { %565 = vsyncadd [#allocation11], 4294967264 }
 0x4dd   :  { %357 = vsyncpa [#allocation4], 1 }
 0x4de   :  { %358 = vsyncpa [#allocation7], 1 }
 0x4df   :  { %359 = vsyncpa [#allocation5], 1 }
 0x4e0   :  { %360 = vsyncpa [#allocation11], 1 }

</bundles_post_ra>
